<compile_context>
chip_gen: v7x
topology: tpu7x:2x2x1
jax: 0.10.0
libtpu: 0.0.40
codegen_flags: <defaults>
</compile_context>

<pallas_src>
import jax
import jax.numpy as jnp
from jax.experimental import pallas as pl
from jax.experimental.pallas import tpu as pltpu

CONTEXT_INPUT_DIM = 32   # CFG.context_input_dim
PROJECTION_DIM = 128     # CFG.projection_dim
LN_EPS = 1e-5            # PyTorch nn.LayerNorm default
FD = 128                 # padded hidden / output lane dim (full MXU lane width)

# LayerNorm stats below sum over all FD lanes and divide by PROJECTION_DIM; this is only
# valid when the projection dim fills the lane tile exactly.
assert PROJECTION_DIM == FD, "kernel LayerNorm assumes projection_dim == FD == 128"


def context_encoder_kernel(x_ref, w1_ref, w23_ref, v_ref, o_ref):
    # x_ref  : (TB, D_IN)   bf16   batch tile of context rows (natural 32-lane width)
    # w1_ref : (D_IN, FD)   bf16   first layer weight, out-dim zero-padded 64 -> 128
    # w23_ref: (2, FD, FD)  bf16   [w2 (row-padded 64->128); w3]
    # v_ref  : (8, FD)      f32    rows: b1, b2, b3, gamma, beta, 0, 0, 0
    # o_ref  : (TB, FD)     f32
    v = v_ref[...]
    b1, b2, b3 = v[0:1], v[1:2], v[2:3]
    gamma, beta = v[3:4], v[4:5]

    # --- MLP hot path: bf16 MXU matmuls, f32 accumulation, f32 VPU elementwise ---
    h = jnp.dot(x_ref[...], w1_ref[...], preferred_element_type=jnp.float32) + b1
    h = jnp.maximum(h, 0.0)
    h = jnp.dot(h.astype(jnp.bfloat16), w23_ref[0], preferred_element_type=jnp.float32) + b2
    h = jnp.maximum(h, 0.0)
    h = jnp.dot(h.astype(jnp.bfloat16), w23_ref[1], preferred_element_type=jnp.float32) + b3

    # --- LayerNorm (two-pass, biased variance, over PROJECTION_DIM lanes) ---
    inv_p = 1.0 / PROJECTION_DIM
    mean = jnp.sum(h, axis=-1, keepdims=True) * inv_p
    centered = h - mean
    var = jnp.sum(centered * centered, axis=-1, keepdims=True) * inv_p
    o_ref[...] = centered * jax.lax.rsqrt(var + LN_EPS) * gamma + beta


def pack_params(params):
    """Pack the 8 parameter tensors into three DMA-friendly slabs."""
    (w1, b1, w2, b2, w3, b3, gamma, beta) = params

    def pad_w(w, rows, cols):
        fi, fo = w.shape
        return jnp.zeros((rows, cols), jnp.bfloat16).at[:fi, :fo].set(w.astype(jnp.bfloat16))

    def pad_v(v):
        v = jnp.asarray(v, jnp.float32).reshape(1, -1)
        return jnp.zeros((1, FD), jnp.float32).at[:, :v.shape[1]].set(v)

    w1_slab = pad_w(w1, CONTEXT_INPUT_DIM, FD)                        # (32, 128) bf16
    w23_slab = jnp.stack([pad_w(w2, FD, FD), pad_w(w3, FD, FD)], 0)   # (2, 128, 128) bf16
    v_slab = jnp.concatenate(
        [pad_v(b1), pad_v(b2), pad_v(b3), pad_v(gamma), pad_v(beta),
         jnp.zeros((3, FD), jnp.float32)], axis=0)                    # (8, 128) f32
    return w1_slab, w23_slab, v_slab


def _choose_tb(b_pad, max_tb=1024):
    """Largest multiple-of-8 divisor of b_pad, <= max_tb, preferring an even grid length
    (>= 2 balanced 'parallel' steps so v7x megacore shards the batch across both TCs)."""
    cap = min(max_tb, b_pad)
    candidates = [tb for tb in range(8, cap + 1, 8) if b_pad % tb == 0]
    even_grid = [tb for tb in candidates if (b_pad // tb) % 2 == 0]
    pool = even_grid if even_grid else candidates
    return max(pool)


def context_encoder_forward(x, w1_slab, w23_slab, v_slab, *, max_block_rows=1024):
    """x: (B, CONTEXT_INPUT_DIM) -> (B, PROJECTION_DIM) f32 via the tiled Pallas path."""
    B, d_in = x.shape
    assert d_in == CONTEXT_INPUT_DIM

    B_pad = ((B + 7) // 8) * 8                      # pad rows to a sublane multiple only
    TB = _choose_tb(B_pad, max_block_rows)

    x_bf16 = x.astype(jnp.bfloat16)
    if B_pad != B:
        x_bf16 = jnp.pad(x_bf16, ((0, B_pad - B), (0, 0)))

    flops = 2 * B_pad * (d_in * FD + FD * FD + FD * FD)
    bytes_accessed = (x_bf16.size * 2 + w1_slab.size * 2 + w23_slab.size * 2
                      + v_slab.size * 4 + B_pad * FD * 4)
    cost = pl.CostEstimate(flops=int(flops), transcendentals=int(B_pad),
                           bytes_accessed=int(bytes_accessed))

    out = pl.pallas_call(
        context_encoder_kernel,
        out_shape=jax.ShapeDtypeStruct((B_pad, FD), jnp.float32),
        grid_spec=pltpu.PrefetchScalarGridSpec(
            num_scalar_prefetch=0,
            grid=(B_pad // TB,),
            in_specs=[
                pl.BlockSpec((TB, d_in), lambda i: (i, 0)),       # batch tile of x (bf16)
                pl.BlockSpec((d_in, FD), lambda i: (0, 0)),       # w1 (resident)
                pl.BlockSpec((2, FD, FD), lambda i: (0, 0, 0)),   # w2/w3 (resident)
                pl.BlockSpec((8, FD), lambda i: (0, 0)),          # biases/affine (resident)
            ],
            out_specs=pl.BlockSpec((TB, FD), lambda i: (i, 0)),
        ),
        compiler_params=pltpu.CompilerParams(dimension_semantics=("parallel",)),
        cost_estimate=cost,
    )(x_bf16, w1_slab, w23_slab, v_slab)
    return out[:B]


def init_params(key, input_dim=CONTEXT_INPUT_DIM, projection_dim=PROJECTION_DIM):
    ks = jax.random.split(key, 8)
    # wav_context ~ Normal(0, std) with std in [0.1, 0.6)
    wav_std = jax.random.uniform(ks[0], (1,)) * 0.5 + 0.1
    wav_context = jax.random.normal(ks[1], (1, input_dim), jnp.float32) * wav_std

    def linear_init(k, fan_in, fan_out):
        # torch.nn.Linear default: U(-1/sqrt(fan_in), 1/sqrt(fan_in))
        kw, kb = jax.random.split(k)
        bound = 1.0 / jnp.sqrt(fan_in)
        w = jax.random.uniform(kw, (fan_in, fan_out), jnp.float32, -bound, bound)
        b = jax.random.uniform(kb, (1, fan_out), jnp.float32, -bound, bound)
        return w, b

    w1, b1 = linear_init(ks[2], input_dim, 64)
    w2, b2 = linear_init(ks[3], 64, 128)
    w3, b3 = linear_init(ks[4], 128, projection_dim)
    gamma = jnp.ones((1, projection_dim), jnp.float32)
    beta = jnp.zeros((1, projection_dim), jnp.float32)
    return wav_context, (w1, b1, w2, b2, w3, b3, gamma, beta)


def reference_forward(x, params):
    """Pure-JAX reference with the same bf16-operand / f32-accumulate matmul convention."""
    (w1, b1, w2, b2, w3, b3, gamma, beta) = params

    def mm(a, w):
        return jnp.dot(a.astype(jnp.bfloat16), w.astype(jnp.bfloat16),
                       preferred_element_type=jnp.float32)

    h = jnp.maximum(mm(x, w1) + b1, 0.0)
    h = jnp.maximum(mm(h, w2) + b2, 0.0)
    h = mm(h, w3) + b3
    mean = jnp.mean(h, axis=-1, keepdims=True)
    var = jnp.mean((h - mean) ** 2, axis=-1, keepdims=True)
    return (h - mean) / jnp.sqrt(var + LN_EPS) * gamma + beta


if __name__ == "__main__":
    key = jax.random.PRNGKey(0)
    wav_context, params = init_params(key)
    w1_slab, w23_slab, v_slab = pack_params(params)

    # --- Module-faithful path: ContextEncoder.forward() uses its learned (1, 32) row ---
    out = jax.block_until_ready(context_encoder_forward(wav_context, w1_slab, w23_slab, v_slab))
    ref = reference_forward(wav_context, params)
    assert out.shape == (1, PROJECTION_DIM)
    assert jnp.allclose(out, ref, atol=1e-2, rtol=1e-2), "mismatch vs JAX reference (B=1)"

    # --- Batched throughput path: many context rows per pallas_call (grid of 2 parallel steps) ---
    xb = jax.random.normal(jax.random.PRNGKey(1), (256, CONTEXT_INPUT_DIM), jnp.float32) * 0.3
    outb = jax.block_until_ready(context_encoder_forward(xb, w1_slab, w23_slab, v_slab))
    refb = reference_forward(xb, params)
    assert outb.shape == (256, PROJECTION_DIM)
    assert jnp.allclose(outb, refb, atol=1e-2, rtol=1e-2), "mismatch vs JAX reference (B=256)"

    print("KERNEL_OK")
</pallas_src>

<mosaic_0001>
module attributes {stable_mosaic.version = 11 : i64} {
  func.func @context_encoder_kernel(%arg0: i32, %arg1: memref<8x32xbf16, #tpu.memory_space<vmem>>, %arg2: memref<32x128xbf16, #tpu.memory_space<vmem>>, %arg3: memref<2x128x128xbf16, #tpu.memory_space<vmem>>, %arg4: memref<8x128xf32, #tpu.memory_space<vmem>>, %arg5: memref<8x128xf32, #tpu.memory_space<vmem>>) attributes {dimension_semantics = [#tpu.dimension_semantics<parallel>], iteration_bounds = array<i64: 1>, scalar_prefetch = 0 : i64, scratch_operands = 0 : i64, tpu.core_type = #tpu.core_type<tc>, window_params = [{transform_indices = @transform_0, window_bounds = array<i64: 8, 32>}, {pipeline_mode = #tpu.pipeline_mode<synchronous>, transform_indices = @transform_1, window_bounds = array<i64: 32, 128>}, {pipeline_mode = #tpu.pipeline_mode<synchronous>, transform_indices = @transform_2, window_bounds = array<i64: 2, 128, 128>}, {pipeline_mode = #tpu.pipeline_mode<synchronous>, transform_indices = @transform_3, window_bounds = array<i64: 8, 128>}, {transform_indices = @transform_4, window_bounds = array<i64: 8, 128>}]} {
    %c0 = arith.constant 0 : index
    %c0_0 = arith.constant 0 : index
    %0 = vector.load %arg4[%c0, %c0_0] : memref<8x128xf32, #tpu.memory_space<vmem>>, vector<8x128xf32>
    %1 = vector.extract_strided_slice %0 {offsets = [0, 0], sizes = [1, 128], strides = [1, 1]} : vector<8x128xf32> to vector<1x128xf32>
    %2 = vector.extract_strided_slice %0 {offsets = [1, 0], sizes = [1, 128], strides = [1, 1]} : vector<8x128xf32> to vector<1x128xf32>
    %3 = vector.extract_strided_slice %0 {offsets = [2, 0], sizes = [1, 128], strides = [1, 1]} : vector<8x128xf32> to vector<1x128xf32>
    %4 = vector.extract_strided_slice %0 {offsets = [3, 0], sizes = [1, 128], strides = [1, 1]} : vector<8x128xf32> to vector<1x128xf32>
    %5 = vector.extract_strided_slice %0 {offsets = [4, 0], sizes = [1, 128], strides = [1, 1]} : vector<8x128xf32> to vector<1x128xf32>
    %c0_1 = arith.constant 0 : index
    %c0_2 = arith.constant 0 : index
    %6 = vector.load %arg1[%c0_1, %c0_2] : memref<8x32xbf16, #tpu.memory_space<vmem>>, vector<8x32xbf16>
    %c0_3 = arith.constant 0 : index
    %c0_4 = arith.constant 0 : index
    %7 = vector.load %arg2[%c0_3, %c0_4] : memref<32x128xbf16, #tpu.memory_space<vmem>>, vector<32x128xbf16>
    %cst = arith.constant dense<0.000000e+00> : vector<8x128xf32>
    %8 = tpu.matmul %6, %7, %cst {dimension_numbers = #tpu.dot_dimension_numbers<[1], [0], [0], [1], [0, 0, 1, 1], [], []>} : vector<8x32xbf16>, vector<32x128xbf16>, vector<8x128xf32> -> vector<8x128xf32>
    %9 = vector.broadcast %1 : vector<1x128xf32> to vector<8x128xf32>
    %10 = arith.addf %8, %9 : vector<8x128xf32>
    %cst_5 = arith.constant 0.000000e+00 : f32
    %11 = vector.broadcast %cst_5 : f32 to vector<8x128xf32>
    %12 = arith.maximumf %10, %11 : vector<8x128xf32>
    %13 = arith.truncf %12 : vector<8x128xf32> to vector<8x128xbf16>
    %c0_6 = arith.constant 0 : index
    %c0_7 = arith.constant 0 : index
    %c0_8 = arith.constant 0 : index
    %14 = vector.load %arg3[%c0_6, %c0_7, %c0_8] : memref<2x128x128xbf16, #tpu.memory_space<vmem>>, vector<1x128x128xbf16>
    %15 = vector.shape_cast %14 : vector<1x128x128xbf16> to vector<128x128xbf16>
    %cst_9 = arith.constant dense<0.000000e+00> : vector<8x128xf32>
    %16 = tpu.matmul %13, %15, %cst_9 {dimension_numbers = #tpu.dot_dimension_numbers<[1], [0], [0], [1], [0, 0, 1, 1], [], []>} : vector<8x128xbf16>, vector<128x128xbf16>, vector<8x128xf32> -> vector<8x128xf32>
    %17 = vector.broadcast %2 : vector<1x128xf32> to vector<8x128xf32>
    %18 = arith.addf %16, %17 : vector<8x128xf32>
    %cst_10 = arith.constant 0.000000e+00 : f32
    %19 = vector.broadcast %cst_10 : f32 to vector<8x128xf32>
    %20 = arith.maximumf %18, %19 : vector<8x128xf32>
    %21 = arith.truncf %20 : vector<8x128xf32> to vector<8x128xbf16>
    %c1 = arith.constant 1 : index
    %c0_11 = arith.constant 0 : index
    %c0_12 = arith.constant 0 : index
    %22 = vector.load %arg3[%c1, %c0_11, %c0_12] : memref<2x128x128xbf16, #tpu.memory_space<vmem>>, vector<1x128x128xbf16>
    %23 = vector.shape_cast %22 : vector<1x128x128xbf16> to vector<128x128xbf16>
    %cst_13 = arith.constant dense<0.000000e+00> : vector<8x128xf32>
    %24 = tpu.matmul %21, %23, %cst_13 {dimension_numbers = #tpu.dot_dimension_numbers<[1], [0], [0], [1], [0, 0, 1, 1], [], []>} : vector<8x128xbf16>, vector<128x128xbf16>, vector<8x128xf32> -> vector<8x128xf32>
    %25 = vector.broadcast %3 : vector<1x128xf32> to vector<8x128xf32>
    %26 = arith.addf %24, %25 : vector<8x128xf32>
    %cst_14 = arith.constant dense<0.000000e+00> : vector<8xf32>
    %27 = vector.multi_reduction <add>, %26, %cst_14 [1] : vector<8x128xf32> to vector<8xf32>
    %28 = vector.shape_cast %27 : vector<8xf32> to vector<8x1xf32>
    %cst_15 = arith.constant 7.812500e-03 : f32
    %29 = vector.broadcast %cst_15 : f32 to vector<8x1xf32>
    %30 = arith.mulf %28, %29 : vector<8x1xf32>
    %31 = vector.broadcast %30 : vector<8x1xf32> to vector<8x128xf32>
    %32 = arith.subf %26, %31 : vector<8x128xf32>
    %33 = arith.mulf %32, %32 : vector<8x128xf32>
    %cst_16 = arith.constant dense<0.000000e+00> : vector<8xf32>
    %34 = vector.multi_reduction <add>, %33, %cst_16 [1] : vector<8x128xf32> to vector<8xf32>
    %35 = vector.shape_cast %34 : vector<8xf32> to vector<8x1xf32>
    %cst_17 = arith.constant 7.812500e-03 : f32
    %36 = vector.broadcast %cst_17 : f32 to vector<8x1xf32>
    %37 = arith.mulf %35, %36 : vector<8x1xf32>
    %cst_18 = arith.constant 9.99999974E-6 : f32
    %38 = vector.broadcast %cst_18 : f32 to vector<8x1xf32>
    %39 = arith.addf %37, %38 : vector<8x1xf32>
    %40 = math.rsqrt %39 : vector<8x1xf32>
    %41 = vector.broadcast %40 : vector<8x1xf32> to vector<8x128xf32>
    %42 = arith.mulf %32, %41 : vector<8x128xf32>
    %43 = vector.broadcast %4 : vector<1x128xf32> to vector<8x128xf32>
    %44 = arith.mulf %42, %43 : vector<8x128xf32>
    %45 = vector.broadcast %5 : vector<1x128xf32> to vector<8x128xf32>
    %46 = arith.addf %44, %45 : vector<8x128xf32>
    %c0_19 = arith.constant 0 : index
    %c0_20 = arith.constant 0 : index
    %47 = vector.load %arg5[%c0_19, %c0_20] : memref<8x128xf32, #tpu.memory_space<vmem>>, vector<8x128xf32>
    tpu.vector_store %arg5[%c0_19, %c0_20], %46 {strides = array<i32>} : memref<8x128xf32, #tpu.memory_space<vmem>>, vector<8x128xf32>,
    return
  }
  func.func @transform_0(%arg0: i32) -> (i32, i32) {
    %c0_i32 = arith.constant 0 : i32
    %c0_i32_0 = arith.constant 0 : i32
    return %arg0, %c0_i32 : i32, i32
  }
  func.func @transform_1(%arg0: i32) -> (i32, i32) {
    %c0_i32 = arith.constant 0 : i32
    %c0_i32_0 = arith.constant 0 : i32
    %c0_i32_1 = arith.constant 0 : i32
    return %c0_i32, %c0_i32_0 : i32, i32
  }
  func.func @transform_2(%arg0: i32) -> (i32, i32, i32) {
    %c0_i32 = arith.constant 0 : i32
    %c0_i32_0 = arith.constant 0 : i32
    %c0_i32_1 = arith.constant 0 : i32
    %c0_i32_2 = arith.constant 0 : i32
    return %c0_i32, %c0_i32_0, %c0_i32_1 : i32, i32, i32
  }
  func.func @transform_3(%arg0: i32) -> (i32, i32) {
    %c0_i32 = arith.constant 0 : i32
    %c0_i32_0 = arith.constant 0 : i32
    %c0_i32_1 = arith.constant 0 : i32
    return %c0_i32, %c0_i32_0 : i32, i32
  }
  func.func @transform_4(%arg0: i32) -> (i32, i32) {
    %c0_i32 = arith.constant 0 : i32
    %c0_i32_0 = arith.constant 0 : i32
    return %arg0, %c0_i32 : i32, i32
  }
}

</mosaic_0001>

<bundles_post_ra>
// kernel: tpu_custom_call.1
= control target key start
LH: loop header
LB: loop body
LE: loop exit
PB: predicated region body
PF: predicated region fallthrough
CT: control target
= control target key end

     0   :  { %9 = vsyncpa [#allocation3], 0  ;;  %s707_s0 = inlined_call_operand.hbm [shape: bf16[8,32], index: 0, kind: input, shape index: {}]   ;;  %s708_s1 = inlined_call_operand.hbm [shape: bf16[32,128], index: 1, kind: input, shape index: {}]   ;;  %s709_s2 = inlined_call_operand.hbm [shape: bf16[2,128,128], index: 2, kind: input, shape index: {}]   ;;  %s710_s3 = inlined_call_operand.vmem [shape: f32[8,128], index: 3, kind: input, shape index: {}]   ;;  %s711_s4 = inlined_call_operand.hbm [shape: f32[8,128], index: 4, kind: output, shape index: {}]  }
   0x1   :  { %10 = vsyncpa [#allocation6], 0 }
   0x2   :  { %11 = vsyncpa [#allocation4], 0  ;;  %s593_s15 = smov [#allocation5]   ;;  %s499_s19 = scalar_lea.hbm %s708_s1, 256 }
   0x3   :  { %s27_s16 = sshll.u32 %s593_s15, 4  ;;  %p500_p0 = scmp.ne.s32.totalorder %s708_s1, %s499_s19  ;;  %s28_s16 = int_to_ptr.vmem [resolvable:$true] %s27_s16 }
   0x4   :  { %p503_p1 = scmp.lt.u32.totalorder %s499_s19, %s708_s1 }
   0x6   :  { %p505_p2 = pnand %p503_p1, %p500_p0 }
   0x8   :  { %508 = shalt.err (!%p505_p2)
}
   0x9   :  { %s509_s24 = scalar_lea.vmem %s28_s16, 256  ;;  %p514_p4 = scmp.lt.s32.totalorder %s28_s16, %s28_s16 }
   0xa   :  { %p510_p3 = scmp.ne.s32.totalorder %s28_s16, %s509_s24  ;;  %p515_p5 = scmp.lt.s32.totalorder %s509_s24, %s509_s24 }
   0xc   :  { %p516_p6 = por %p515_p5, %p514_p4 }
   0xe   :  { %p517_p7 = pnand %p516_p6, %p510_p3 }
  0x10   :  { %520 = shalt.err (!%p517_p7)
}
  0x11   :  { %s594_s25 = smov 64   ;;  %s595_s26 = smov 4  }
  0x12   :  { %33 = dma.hbm_to_vmem [thread:$0]  %s708_s1, 256, %s28_s16, [#allocation6], %s594_s25, %s594_s25, %s595_s26  }
  0x13   :  { %s596_s29 = smov [#allocation2]   ;;  %s597_s5 = smov [#allocation7]  }
  0x14   :  { %s18_s30 = sshll.u32 %s596_s29, 4  ;;  %s39_s6 = sshll.u32 %s597_s5, 4  ;;  %s19_s30 = int_to_ptr.vmem [resolvable:$true] %s18_s30  ;;  %s40_s6 = int_to_ptr.vmem [resolvable:$true] %s39_s6 }
  0x15   :  { %s521_s9 = scalar_lea.hbm %s707_s0, 64 }
  0x16   :  { %p522_p8 = scmp.ne.s32.totalorder %s707_s0, %s521_s9  ;;  %p525_p9 = scmp.lt.u32.totalorder %s521_s9, %s707_s0 }
  0x18   :  { %p527_p10 = pnand %p525_p9, %p522_p8 }
  0x1a   :  { %530 = shalt.err (!%p527_p10)
}
  0x1b   :  { %s531_s1 = scalar_lea.vmem %s19_s30, 64  ;;  %p536_p12 = scmp.lt.s32.totalorder %s19_s30, %s19_s30 }
  0x1c   :  { %p532_p11 = scmp.ne.s32.totalorder %s19_s30, %s531_s1  ;;  %p537_p13 = scmp.lt.s32.totalorder %s531_s1, %s531_s1 }
  0x1e   :  { %p538_p0 = por %p537_p13, %p536_p12 }
  0x20   :  { %p539_p1 = pnand %p538_p0, %p532_p11 }
  0x22   :  { %542 = shalt.err (!%p539_p1)
}
  0x23   :  { %21 = dma.hbm_to_vmem [thread:$0]  %s707_s0, 64, %s19_s30, [#allocation3]  }
  0x24   :  { %s543_s18 = scalar_lea.hbm %s709_s2, 2048 }
  0x25   :  { %p544_p2 = scmp.ne.s32.totalorder %s709_s2, %s543_s18  ;;  %p547_p3 = scmp.lt.u32.totalorder %s543_s18, %s709_s2 }
  0x27   :  { %p549_p4 = pnand %p547_p3, %p544_p2 }
  0x29   :  { %552 = shalt.err (!%p549_p4)
}
  0x2a   :  { %s553_s23 = scalar_lea.vmem %s40_s6, 2048  ;;  %p558_p6 = scmp.lt.s32.totalorder %s40_s6, %s40_s6 }
  0x2b   :  { %p554_p5 = scmp.ne.s32.totalorder %s40_s6, %s553_s23  ;;  %p559_p7 = scmp.lt.s32.totalorder %s553_s23, %s553_s23 }
  0x2d   :  { %p560_p8 = por %p559_p7, %p558_p6 }
  0x2f   :  { %p561_p9 = pnand %p560_p8, %p554_p5 }
  0x31   :  { %564 = shalt.err (!%p561_p9)
}
  0x32   :  { %45 = dma.hbm_to_vmem [thread:$0]  %s709_s2, 2048, %s40_s6, [#allocation6], %s594_s25, %s594_s25, %s595_s26  }
  0x33   :  { %587 = dma.done.wait [#allocation3], 64  }
  0x34   :  { %588 = vsyncadd [#allocation3], 4294967232 }
  0x35   :  { %589 = dma.done.wait [#allocation6], 2304  }
  0x36   :  { %590 = vsyncadd [#allocation6], 4294964992  ;;  %v598_v0 = vmov 0.0   ;;  %vm599_vm0 = vmmov 0   ;;  %v479_v1 = vld [vmem:[#allocation5] sm:$0xff]   ;;  %v480_v2 = vld [vmem:[#allocation5 + $0x8] sm:$0xff]   ;;  %v64_v18 = vlaneseq }
  0x37   :  { %423 = vmatprep.subr.bf16.mxu0 %v598_v0  ;;  %427 = vmatprep.mubr.msk.bf16.mxu0 %vm599_vm0, %v598_v0  ;;  %v481_v3 = vld [vmem:[#allocation7] sm:$0xff]   ;;  %vm80_vm1 = vcmask 261120   ;;  %v482_v4 = vld [vmem:[#allocation7 + $0x8] sm:$0xff]   ;;  %v483_v6 = vld [vmem:[#allocation7 + $0x10] sm:$0xff]  }
  0x38   :  { %431 = vmatprep.subr.bf16.mxu1 %v598_v0  ;;  %447 = vmatprep.mubr.msk.bf16.mxu1 %vm599_vm0, %v598_v0  ;;  %v59_v5 = vld [vmem:[#allocation2] sm:$0xf]  ;;  %v484_v7 = vld [vmem:[#allocation7 + $0x18] sm:$0xff]   ;;  %v485_v8 = vld [vmem:[#allocation7 + $0x20] sm:$0xff]   ;;  %v65_v19 = vshrl.u32 %v64_v18, 7 }
  0x39   :  { %424 = vmatpush3.bf16.msra.mxu0 %v479_v1  ;;  %432 = vmatpush3.bf16.msra.mxu1 %v481_v3  ;;  %v486_v9 = vld [vmem:[#allocation7 + $0x28] sm:$0xff]   ;;  %v487_v10 = vld [vmem:[#allocation7 + $0x30] sm:$0xff]   ;;  %v488_v11 = vld [vmem:[#allocation7 + $0x38] sm:$0xff]  }
  0x3a   :  { %425 = vmatprep.subr.bf16.mxu0 %v598_v0  ;;  %433 = vmatprep.subr.bf16.mxu1 %v598_v0  ;;  %v489_v12 = vld [vmem:[#allocation7 + $0x40] sm:$0xff]   ;;  %v490_v13 = vld [vmem:[#allocation7 + $0x48] sm:$0xff]   ;;  %v491_v14 = vld [vmem:[#allocation7 + $0x50] sm:$0xff]   ;;  %v66_v20 = vsub.s32 0, %v65_v19  ;;  %v144_v32 = vsub.s32 1, %v65_v19  ;;  %v255_v41 = vsub.s32 2, %v65_v19 }
  0x3b   :  { %v492_v15 = vld [vmem:[#allocation7 + $0x58] sm:$0xff]   ;;  %v493_v16 = vld [vmem:[#allocation7 + $0x60] sm:$0xff]   ;;  %v494_v17 = vld [vmem:[#allocation7 + $0x68] sm:$0xff]   ;;  %v358_v55 = vsub.s32 3, %v65_v19  ;;  %v363_v56 = vsub.s32 4, %v65_v19 }
  0x3c   :  { %v58_v21 = vld [vmem:[%s710_s3] sm:$0xff]  ;;  %v495_v30 = vld [vmem:[#allocation7 + $0x70] sm:$0xff]   ;;  %v496_v31 = vld [vmem:[#allocation7 + $0x78] sm:$0xff]   ;;  %s600_s3 = smov [#allocation8]  }
  0x3d   :  { %426 = vmatpush3.bf16.msra.mxu0 %v480_v2  ;;  %434 = vmatpush3.bf16.msra.mxu1 %v482_v4  ;;  %v67_v22 = vrot.slane %v58_v21, %v66_v20  ;;  %v145_v33 = vrot.slane %v58_v21, %v144_v32  ;;  %v256_v42 = vrot.slane %v58_v21, %v255_v41  ;;  %s373_s26 = sshll.u32 %s600_s3, 4  ;;  %s374_s26 = int_to_ptr.vmem [resolvable:$true] %s373_s26 }
  0x3e   :  { %451 = vmatprep.subr.bf16.mxu0 %v598_v0  ;;  %435 = vmatprep.subr.bf16.mxu1 %v598_v0  ;;  %v359_v57 = vrot.slane %v58_v21, %v358_v55  ;;  %v364_v60 = vrot.slane %v58_v21, %v363_v56  ;;  %s565_s27 = scalar_lea.vmem %s374_s26, 128  ;;  %p570_p11 = scmp.lt.s32.totalorder %s374_s26, %s374_s26 }
  0x3f   :  { %p566_p10 = scmp.ne.s32.totalorder %s374_s26, %s565_s27  ;;  %p571_p12 = scmp.lt.s32.totalorder %s565_s27, %s565_s27 }
  0x40   :  { %428 = vmatmul.mubr.msk.bf16.vlgmr.msra.gmra.mrb[0].mxu0 %vm80_vm1, %v59_v5 }
  0x41   :  { %467 = vmatprep.mubr.msk.bf16.mxu0 %vm599_vm0, %v598_v0  ;;  %436 = vmatpush3.bf16.msra.mxu1 %v483_v6  ;;  %p572_p13 = por %p571_p12, %p570_p11 }
  0x42   :  { %437 = vmatprep.subr.bf16.mxu1 %v598_v0  ;;  %452 = vmatpush3.bf16.msra.mxu0 %v489_v12 }
  0x43   :  { %453 = vmatprep.subr.bf16.mxu0 %v598_v0  ;;  %p573_p0 = pnand %p572_p13, %p566_p10 }
  0x45   :  { %438 = vmatpush3.bf16.msra.mxu1 %v484_v7 }
  0x46   :  { %439 = vmatprep.subr.bf16.mxu1 %v598_v0  ;;  %454 = vmatpush3.bf16.msra.mxu0 %v490_v13 }
  0x47   :  { %455 = vmatprep.subr.bf16.mxu0 %v598_v0 }
  0x49   :  { %440 = vmatpush3.bf16.msra.mxu1 %v485_v8 }
  0x4a   :  { %441 = vmatprep.subr.bf16.mxu1 %v598_v0  ;;  %456 = vmatpush3.bf16.msra.mxu0 %v491_v14 }
  0x4b   :  { %457 = vmatprep.subr.bf16.mxu0 %v598_v0 }
  0x4d   :  { %442 = vmatpush3.bf16.msra.mxu1 %v486_v9 }
  0x4e   :  { %443 = vmatprep.subr.bf16.mxu1 %v598_v0  ;;  %458 = vmatpush3.bf16.msra.mxu0 %v492_v15 }
  0x4f   :  { %459 = vmatprep.subr.bf16.mxu0 %v598_v0 }
  0x51   :  { %444 = vmatpush3.bf16.msra.mxu1 %v487_v10 }
  0x52   :  { %445 = vmatprep.subr.bf16.mxu1 %v598_v0  ;;  %460 = vmatpush3.bf16.msra.mxu0 %v493_v16 }
  0x53   :  { %461 = vmatprep.subr.bf16.mxu0 %v598_v0 }
  0x55   :  { %446 = vmatpush3.bf16.msra.mxu1 %v488_v11 }
  0x56   :  { %462 = vmatpush3.bf16.msra.mxu0 %v494_v17 }
  0x57   :  { %463 = vmatprep.subr.bf16.mxu0 %v598_v0 }
  0x5a   :  { %464 = vmatpush3.bf16.msra.mxu0 %v495_v30 }
  0x5b   :  { %465 = vmatprep.subr.bf16.mxu0 %v598_v0 }
  0x5e   :  { %466 = vmatpush3.bf16.msra.mxu0 %v496_v31 }
 0x113   :  { %v118_v23 = vpop.f32.mrb[0].mxu0 }
 0x114   :  { %v119_v24 = vadd.f32 %v118_v23, %v67_v22  ;;  %v429_v25 = vpop.f32.mrb[1].mxu0 }
 0x115   :  { %v121_v26 = vpop.f32.mrb[2].mxu0 }
 0x116   :  { %v124_v27 = vmax.f32 %v119_v24, 0.0  ;;  %v430_v28 = vpop.f32.mrb[3].mxu0 }
 0x118   :  { %v125_v29 = vpack.c.bf16 %v124_v27, %v124_v27 }
 0x11a   :  { %448 = vmatmul.mubr.bf16.vlgmr.msra.gmra.mrb[0].mxu1 %v125_v29 }
 0x1ed   :  { %v228_v34 = vpop.f32.mrb[0].mxu1 }
 0x1ee   :  { %v229_v35 = vadd.f32 %v228_v34, %v145_v33  ;;  %v449_v36 = vpop.f32.mrb[1].mxu1 }
 0x1ef   :  { %v231_v37 = vpop.f32.mrb[2].mxu1 }
 0x1f0   :  { %v234_v38 = vmax.f32 %v229_v35, 0.0  ;;  %v450_v39 = vpop.f32.mrb[3].mxu1 }
 0x1f2   :  { %v235_v40 = vpack.c.bf16 %v234_v38, %v234_v38 }
 0x1f4   :  { %468 = vmatmul.mubr.bf16.vlgmr.msra.gmra.mrb[4].mxu0 %v235_v40 }
 0x2c7   :  { %v339_v43 = vpop.f32.mrb[4].mxu0 }
 0x2c8   :  { %v340_v44 = vadd.f32 %v339_v43, %v256_v42  ;;  %v469_v45 = vpop.f32.mrb[5].mxu0 }
 0x2c9   :  { %v342_v46 = vpop.f32.mrb[6].mxu0 }
 0x2ca   :  { %345 = vadd.xlane.f32.xlu0 %v340_v44  ;;  %v470_v47 = vpop.f32.mrb[7].mxu0 }
 0x357   :  { %v346_v48 = vpop.xlane.xlu0 %345 }
 0x358   :  { %v347_v49 = vmul.f32 0.0078125, %v346_v48 }
 0x35a   :  { %v348_v50 = vsub.f32 %v340_v44, %v347_v49 }
 0x35c   :  { %v349_v51 = vmul.f32 %v348_v50, %v348_v50 }
 0x35e   :  { %350 = vadd.xlane.f32.xlu0 %v349_v51 }
 0x3eb   :  { %v351_v52 = vpop.xlane.xlu0 %350 }
 0x3ec   :  { %v352_v53 = vmul.f32 0.0078125, %v351_v52 }
 0x3ee   :  { %v353_v54 = vadd.f32 1e-05, %v352_v53 }
 0x3f0   :  { %497 = vrsqrt.f32 %v353_v54 }
 0x3fa   :  { %v498_v58 = vpop.eup %497 }
 0x3fb   :  { %v355_v59 = vmul.f32 %v498_v58, %v348_v50 }
 0x3fd   :  { %v360_v61 = vmul.f32 %v359_v57, %v355_v59 }
 0x3ff   :  { %v365_v62 = vadd.f32 %v364_v60, %v360_v61 }
 0x401   :  { %366 = vst [vmem:[#allocation8] sm:$0xff] %v365_v62 }
 0x402   :  { %576 = shalt.err (!%p573_p0)
}
 0x403   :  { %s577_s30 = scalar_lea.hbm %s711_s4, 128 }
 0x404   :  { %p578_p1 = scmp.ne.s32.totalorder %s711_s4, %s577_s30  ;;  %p581_p2 = scmp.lt.u32.totalorder %s577_s30, %s711_s4 }
 0x406   :  { %p583_p3 = pnand %p581_p2, %p578_p1 }
 0x408   :  { %586 = shalt.err (!%p583_p3)
}
 0x409   :  { %376 = dma.vmem_to_hbm [thread:$0]  %s374_s26, 128, %s711_s4, [#allocation4]  }
 0x40a   :  { %591 = dma.done.wait [#allocation4], 128  }
 0x40b   :  { %592 = vsyncadd [#allocation4], 4294967168 }
 0x40c   :  { %380 = vsyncpa [#allocation3], 1 }
 0x40d   :  { %381 = vsyncpa [#allocation6], 1 }
 0x40e   :  { %382 = vsyncpa [#allocation4], 1 }

</bundles_post_ra>
